<compile_context>
chip_gen: v6e
topology: v6e:2x2x1
jax: 0.10.0
libtpu: 0.0.40
codegen_flags: <defaults>
</compile_context>

<pallas_src>
import functools
import math

import jax
import jax.numpy as jnp
from jax.experimental import pallas as pl
from jax.experimental.pallas import tpu as pltpu

LEAKY_SLOPE = 0.1
BN_EPS = 1e-5
LANES = 128


def _residual_block_kernel(*refs, R, H, W, has_shortcut):
    if has_shortcut:
        (x_ref, b1_ref, b2_ref, bsc_ref, sch_ref,
         g1_ref, be1_ref, g2_ref, be2_ref, out_ref) = refs
    else:
        (x_ref, b1_ref, b2_ref, sch_ref,
         g1_ref, be1_ref, g2_ref, be2_ref, out_ref) = refs
        bsc_ref = None

    x2d = x_ref[...]                      # (R, W*Cin_p)  lane-dense
    schan = sch_ref[...]                  # (W*Cout_p, W*Cout_p) channel fold matrix
    g1 = g1_ref[...]; be1 = be1_ref[...]  # (1, W*Cout_p) lane-replicated BN params
    g2 = g2_ref[...]; be2 = be2_ref[...]

    # h index of every row (rows are n*H + h); used to zero the kh taps that fall
    # outside the image (replaces an explicitly zero-padded scratch buffer).
    h_idx = jax.lax.broadcasted_iota(jnp.int32, (R, 1), 0) % H

    def taps3(a):
        # (R, L) -> (R, 3L): [x[h-1], x[h], x[h+1]] concatenated along lanes.
        # Sublane rotations run on the XLU (free slot); the masks fix both the
        # image boundary and the wrap across images of the flattened N*H axis.
        up = jnp.where(h_idx == 0, 0.0, pltpu.roll(a, 1, 0))          # x[h-1]
        dn = jnp.where(h_idx == H - 1, 0.0, pltpu.roll(a, R - 1, 0))  # x[h+1]
        return jnp.concatenate([up, a, dn], axis=-1)

    def batchnorm(y, gamma_l, beta_l):
        # Training-mode BN in one pass: per-channel sum and sum-of-squares.
        cnt = jnp.float32(R * W)                       # N*H*W
        s1 = jnp.sum(y, axis=0, keepdims=True)         # (1, L)
        s2 = jnp.sum(y * y, axis=0, keepdims=True)     # (1, L)
        # Fold the W positions of each channel with a tiny matmul; the result is
        # already replicated across lanes, so y never needs a relayout.
        st = jnp.dot(jnp.concatenate([s1, s2], axis=0), schan,
                     preferred_element_type=jnp.float32)               # (2, L)
        mean = st[0:1, :] / cnt
        var = st[1:2, :] / cnt - mean * mean
        scale = gamma_l * jax.lax.rsqrt(var + BN_EPS)
        return y * scale + (beta_l - mean * scale)

    def leaky(y):
        return jnp.where(y > 0, y, LEAKY_SLOPE * y)

    # conv1 (single im2col matmul, K = 3*W*Cin_p) -> BN -> LeakyReLU
    # TODO(synk): for v6e/v7x throughput the matmul inputs could be cast to bf16
    # (f32 accumulation); kept in f32 to match PyTorch's f32 forward exactly.
    y1 = jnp.dot(taps3(x2d), b1_ref[...], preferred_element_type=jnp.float32)
    a1 = leaky(batchnorm(y1, g1, be1))

    # conv2 -> BN
    y2 = batchnorm(
        jnp.dot(taps3(a1), b2_ref[...], preferred_element_type=jnp.float32),
        g2, be2)

    # shortcut: folded 1x1 conv, or plain identity when Cin == Cout
    sc = (jnp.dot(x2d, bsc_ref[...], preferred_element_type=jnp.float32)
          if has_shortcut else x2d)

    out_ref[...] = leaky(y2 + sc)          # dense 128-lane store


def _pad_channels(c, width):
    # smallest c' >= c with (width * c') % 128 == 0 (keeps the folded lane dim dense)
    step = LANES // math.gcd(width, LANES)
    return ((c + step - 1) // step) * step


def _fold_conv3x3(w_hwio, cin_p, cout_p, width):
    # (3,3,Cin,Cout) -> (3*W*Cin_p, W*Cout_p): rows are the three kh taps
    # (concatenated in kh order); kw shifts and the W zero padding are encoded
    # as shifted block diagonals; channels are zero-padded to lane-dense sizes.
    kh_, kw_, cin, cout = w_hwio.shape
    assert (kh_, kw_) == (3, 3), "kernel folded for kernel_size=3, padding=1"
    wp = jnp.zeros((3, 3, cin_p, cout_p), jnp.float32)
    wp = wp.at[:, :, :cin, :cout].set(w_hwio.astype(jnp.float32))
    blocks = []
    for kh in range(3):
        blk = jnp.zeros((width * cin_p, width * cout_p), jnp.float32)
        for kw in range(3):
            dw = kw - 1
            # shift[w_in, w_out] = 1  iff  w_in == w_out + dw  (zero outside -> pad)
            shift = jnp.eye(width, k=-dw, dtype=jnp.float32)
            blk = blk + jnp.kron(shift, wp[kh, kw])
        blocks.append(blk)
    return jnp.concatenate(blocks, axis=0)


def residual_block_pallas(x_nchw, params):
    """x_nchw: (N, Cin, H, W) f32 -> (N, Cout, H, W) f32.
    params = (w1 HWIO, w2 HWIO, wsc (Cin,Cout) or None for identity, g1, b1, g2, b2)."""
    w1, w2, wsc, g1, b1, g2, b2 = params
    N, Cin, H, W = x_nchw.shape
    _, _, _, Cout = w1.shape

    cip = _pad_channels(Cin, W)
    cop = _pad_channels(Cout, W)
    R = N * H
    L_in, L_out = W * cip, W * cop

    # Fold the activation to (N*H, W*C): channels on lanes, W*C multiple of 128.
    # TODO(synk): in a full model keep this folded layout end-to-end instead of
    # transposing at every block boundary (saves ~2 activation HBM round trips).
    x = jnp.transpose(x_nchw, (0, 2, 3, 1)).astype(jnp.float32)   # NHWC
    if cip != Cin:
        x = jnp.pad(x, ((0, 0), (0, 0), (0, 0), (0, cip - Cin)))
    x2d = x.reshape(R, L_in)

    b1m = _fold_conv3x3(w1, cip, cop, W)                 # (3*L_in,  L_out)
    b2m = _fold_conv3x3(w2, cop, cop, W)                 # (3*L_out, L_out)

    has_shortcut = wsc is not None
    inputs = [x2d, b1m, b2m]
    if has_shortcut:
        wscp = jnp.zeros((cip, cop), jnp.float32).at[:Cin, :Cout].set(
            wsc.astype(jnp.float32))
        inputs.append(jnp.kron(jnp.eye(W, dtype=jnp.float32), wscp))   # (L_in, L_out)

    # constant per-channel "replicate + sum over W" matrix for the BN statistics
    schan = jnp.kron(jnp.ones((W, W), jnp.float32),
                     jnp.eye(cop, dtype=jnp.float32))                  # (L_out, L_out)

    def lane_rep(v, fill):
        vp = jnp.full((cop,), fill, jnp.float32).at[:Cout].set(v.astype(jnp.float32))
        return jnp.tile(vp, W).reshape(1, L_out)

    inputs += [schan, lane_rep(g1, 1.0), lane_rep(b1, 0.0),
               lane_rep(g2, 1.0), lane_rep(b2, 0.0)]

    kernel = functools.partial(_residual_block_kernel,
                               R=R, H=H, W=W, has_shortcut=has_shortcut)
    vspec = pl.BlockSpec(memory_space=pltpu.MemorySpace.VMEM)

    # Whole problem (a few hundred KiB) lives in VMEM; gridless call, no pipeline.
    # TODO(synk): for large N*H*W, tile over an N/H grid axis ("parallel" for v7x
    # megacore, fits the 64 MiB/TC VMEM budget) with a two-pass BN (accumulate
    # per-channel sum/sumsq, then normalize) so batch statistics stay exact.
    out2d = pl.pallas_call(
        kernel,
        out_shape=jax.ShapeDtypeStruct((R, L_out), jnp.float32),
        in_specs=[vspec] * len(inputs),
        out_specs=vspec,
    )(*inputs)

    out = out2d.reshape(N, H, W, cop)[..., :Cout]
    return jnp.transpose(out, (0, 3, 1, 2))               # back to NCHW


def residual_block_ref(x_nchw, params):
    """Pure-JAX reference (NCHW) used only to validate the kernel."""
    w1, w2, wsc, g1, b1, g2, b2 = params
    dn = ('NCHW', 'HWIO', 'NCHW')

    def conv(x, w, pad):
        return jax.lax.conv_general_dilated(
            x, w, (1, 1), [(pad, pad), (pad, pad)], dimension_numbers=dn)

    def bn(y, gamma, beta):
        mean = jnp.mean(y, axis=(0, 2, 3), keepdims=True)
        var = jnp.mean((y - mean) ** 2, axis=(0, 2, 3), keepdims=True)
        return ((y - mean) * jax.lax.rsqrt(var + BN_EPS)
                * gamma.reshape(1, -1, 1, 1) + beta.reshape(1, -1, 1, 1))

    def lrelu(y):
        return jnp.where(y > 0, y, LEAKY_SLOPE * y)

    sc = x_nchw if wsc is None else conv(x_nchw, wsc.reshape(1, 1, *wsc.shape), 0)
    y = lrelu(bn(conv(x_nchw, w1, 1), g1, b1))
    y = bn(conv(y, w2, 1), g2, b2)
    return lrelu(y + sc)


if __name__ == "__main__":
    key = jax.random.PRNGKey(0)
    ks = jax.random.split(key, 12)

    # --- projection-shortcut case (Cin != Cout), the ResidualBlock(4, 8) config ---
    N, Cin, Cout, H, W = 2, 4, 8, 16, 16
    x = jax.random.normal(ks[0], (N, Cin, H, W), jnp.float32)
    w1 = 0.1 * jax.random.normal(ks[1], (3, 3, Cin, Cout), jnp.float32)
    w2 = 0.1 * jax.random.normal(ks[2], (3, 3, Cout, Cout), jnp.float32)
    wsc = 0.1 * jax.random.normal(ks[3], (Cin, Cout), jnp.float32)   # 1x1 conv weight
    g1 = 1.0 + 0.1 * jax.random.normal(ks[4], (Cout,), jnp.float32)
    b1 = 0.1 * jax.random.normal(ks[5], (Cout,), jnp.float32)
    g2 = 1.0 + 0.1 * jax.random.normal(ks[6], (Cout,), jnp.float32)
    b2 = 0.1 * jax.random.normal(ks[7], (Cout,), jnp.float32)
    params = (w1, w2, wsc, g1, b1, g2, b2)

    out = jax.block_until_ready(residual_block_pallas(x, params))
    ref = residual_block_ref(x, params)
    assert out.shape == (N, Cout, H, W)
    err = float(jnp.max(jnp.abs(out - ref)))
    assert jnp.allclose(out, ref, atol=1e-4, rtol=1e-4), f"max abs err {err}"

    # --- identity-shortcut case (Cin == Cout) ---
    C = 8
    xi = jax.random.normal(ks[8], (N, C, H, W), jnp.float32)
    w1i = 0.1 * jax.random.normal(ks[9], (3, 3, C, C), jnp.float32)
    w2i = 0.1 * jax.random.normal(ks[10], (3, 3, C, C), jnp.float32)
    params_i = (w1i, w2i, None, g1, b1, g2, b2)
    outi = jax.block_until_ready(residual_block_pallas(xi, params_i))
    refi = residual_block_ref(xi, params_i)
    erri = float(jnp.max(jnp.abs(outi - refi)))
    assert jnp.allclose(outi, refi, atol=1e-4, rtol=1e-4), f"max abs err {erri}"

    print("KERNEL_OK")
</pallas_src>

<mosaic_0001>
module attributes {stable_mosaic.version = 11 : i64} {
  func.func @_residual_block_kernel(%arg0: memref<32x128xf32, #tpu.memory_space<vmem>>, %arg1: memref<384x128xf32, #tpu.memory_space<vmem>>, %arg2: memref<384x128xf32, #tpu.memory_space<vmem>>, %arg3: memref<128x128xf32, #tpu.memory_space<vmem>>, %arg4: memref<128x128xf32, #tpu.memory_space<vmem>>, %arg5: memref<1x128xf32, #tpu.memory_space<vmem>>, %arg6: memref<1x128xf32, #tpu.memory_space<vmem>>, %arg7: memref<1x128xf32, #tpu.memory_space<vmem>>, %arg8: memref<1x128xf32, #tpu.memory_space<vmem>>, %arg9: memref<32x128xf32, #tpu.memory_space<vmem>>) attributes {dimension_semantics = [], scalar_prefetch = 0 : i64, scratch_operands = 0 : i64, tpu.core_type = #tpu.core_type<tc>} {
    %c0 = arith.constant 0 : index
    %c0_0 = arith.constant 0 : index
    %0 = vector.load %arg0[%c0, %c0_0] : memref<32x128xf32, #tpu.memory_space<vmem>>, vector<32x128xf32>
    %c0_1 = arith.constant 0 : index
    %c0_2 = arith.constant 0 : index
    %1 = vector.load %arg4[%c0_1, %c0_2] : memref<128x128xf32, #tpu.memory_space<vmem>>, vector<128x128xf32>
    %c0_3 = arith.constant 0 : index
    %c0_4 = arith.constant 0 : index
    %2 = vector.load %arg5[%c0_3, %c0_4] : memref<1x128xf32, #tpu.memory_space<vmem>>, vector<1x128xf32>
    %c0_5 = arith.constant 0 : index
    %c0_6 = arith.constant 0 : index
    %3 = vector.load %arg6[%c0_5, %c0_6] : memref<1x128xf32, #tpu.memory_space<vmem>>, vector<1x128xf32>
    %c0_7 = arith.constant 0 : index
    %c0_8 = arith.constant 0 : index
    %4 = vector.load %arg7[%c0_7, %c0_8] : memref<1x128xf32, #tpu.memory_space<vmem>>, vector<1x128xf32>
    %c0_9 = arith.constant 0 : index
    %c0_10 = arith.constant 0 : index
    %5 = vector.load %arg8[%c0_9, %c0_10] : memref<1x128xf32, #tpu.memory_space<vmem>>, vector<1x128xf32>
    %6 = tpu.iota {dimensions = array<i32: 0>} : vector<32x1xi32>
    %c16_i32 = arith.constant 16 : i32
    %c0_i32 = arith.constant 0 : i32
    %7 = arith.cmpi eq, %c16_i32, %c0_i32 : i32
    %c1_i32 = arith.constant 1 : i32
    %8 = arith.select %7, %c1_i32, %c16_i32 : i32
    %9 = vector.broadcast %8 : i32 to vector<32x1xi32>
    %10 = arith.remsi %6, %9 : vector<32x1xi32>
    %c0_i32_11 = arith.constant 0 : i32
    %11 = vector.broadcast %c0_i32_11 : i32 to vector<32x1xi32>
    %12 = arith.cmpi ne, %10, %11 : vector<32x1xi32>
    %c0_i32_12 = arith.constant 0 : i32
    %13 = vector.broadcast %c0_i32_12 : i32 to vector<32x1xi32>
    %14 = arith.cmpi slt, %10, %13 : vector<32x1xi32>
    %c0_i32_13 = arith.constant 0 : i32
    %15 = arith.cmpi slt, %8, %c0_i32_13 : i32
    %16 = vector.broadcast %15 : i1 to vector<32x1xi1>
    %17 = vector.broadcast %16 : vector<32x1xi1> to vector<32x1xi1>
    %18 = arith.xori %14, %17 : vector<32x1xi1>
    %19 = arith.andi %18, %12 : vector<32x1xi1>
    %20 = vector.broadcast %8 : i32 to vector<32x1xi32>
    %21 = arith.addi %10, %20 : vector<32x1xi32>
    %22 = arith.select %19, %21, %10 : vector<32x1xi1>, vector<32x1xi32>
    %c0_i32_14 = arith.constant 0 : i32
    %23 = vector.broadcast %c0_i32_14 : i32 to vector<32x1xi32>
    %24 = arith.cmpi eq, %22, %23 : vector<32x1xi32>
    %c1_i32_15 = arith.constant 1 : i32
    %25 = tpu.dynamic_rotate %0 by %c1_i32_15 dim 0 : vector<32x128xf32>, i32 -> vector<32x128xf32>
    %cst = arith.constant 0.000000e+00 : f32
    %26 = vector.shape_cast %24 : vector<32x1xi1> to vector<32x1xi1>
    %27 = vector.broadcast %26 : vector<32x1xi1> to vector<32x128xi1>
    %28 = vector.broadcast %cst : f32 to vector<32x128xf32>
    %29 = arith.select %27, %28, %25 : vector<32x128xi1>, vector<32x128xf32>
    %c15_i32 = arith.constant 15 : i32
    %30 = vector.broadcast %c15_i32 : i32 to vector<32x1xi32>
    %31 = arith.cmpi eq, %22, %30 : vector<32x1xi32>
    %c31_i32 = arith.constant 31 : i32
    %32 = tpu.dynamic_rotate %0 by %c31_i32 dim 0 : vector<32x128xf32>, i32 -> vector<32x128xf32>
    %cst_16 = arith.constant 0.000000e+00 : f32
    %33 = vector.shape_cast %31 : vector<32x1xi1> to vector<32x1xi1>
    %34 = vector.broadcast %33 : vector<32x1xi1> to vector<32x128xi1>
    %35 = vector.broadcast %cst_16 : f32 to vector<32x128xf32>
    %36 = arith.select %34, %35, %32 : vector<32x128xi1>, vector<32x128xf32>
    %37 = tpu.concatenate %29, %0, %36 in 1 : vector<32x128xf32>, vector<32x128xf32>, vector<32x128xf32> -> vector<32x384xf32>
    %c0_17 = arith.constant 0 : index
    %c0_18 = arith.constant 0 : index
    %38 = vector.load %arg1[%c0_17, %c0_18] : memref<384x128xf32, #tpu.memory_space<vmem>>, vector<384x128xf32>
    %cst_19 = arith.constant dense<0.000000e+00> : vector<32x128xf32>
    %39 = tpu.matmul %37, %38, %cst_19 {dimension_numbers = #tpu.dot_dimension_numbers<[1], [0], [0], [1], [0, 0, 1, 1], [], []>} : vector<32x384xf32>, vector<384x128xf32>, vector<32x128xf32> -> vector<32x128xf32>
    %cst_20 = arith.constant dense<0.000000e+00> : vector<128xf32>
    %40 = vector.multi_reduction <add>, %39, %cst_20 [0] : vector<32x128xf32> to vector<128xf32>
    %41 = vector.shape_cast %40 : vector<128xf32> to vector<1x128xf32>
    %42 = arith.mulf %39, %39 : vector<32x128xf32>
    %cst_21 = arith.constant dense<0.000000e+00> : vector<128xf32>
    %43 = vector.multi_reduction <add>, %42, %cst_21 [0] : vector<32x128xf32> to vector<128xf32>
    %44 = vector.shape_cast %43 : vector<128xf32> to vector<1x128xf32>
    %45 = tpu.concatenate %41, %44 in 0 : vector<1x128xf32>, vector<1x128xf32> -> vector<2x128xf32>
    %cst_22 = arith.constant dense<0.000000e+00> : vector<2x128xf32>
    %46 = tpu.matmul %45, %1, %cst_22 {dimension_numbers = #tpu.dot_dimension_numbers<[1], [0], [0], [1], [0, 0, 1, 1], [], []>} : vector<2x128xf32>, vector<128x128xf32>, vector<2x128xf32> -> vector<2x128xf32>
    %47 = vector.extract_strided_slice %46 {offsets = [0, 0], sizes = [1, 128], strides = [1, 1]} : vector<2x128xf32> to vector<1x128xf32>
    %cst_23 = arith.constant 5.120000e+02 : f32
    %48 = vector.broadcast %cst_23 : f32 to vector<1x128xf32>
    %49 = arith.divf %47, %48 : vector<1x128xf32>
    %50 = vector.extract_strided_slice %46 {offsets = [1, 0], sizes = [1, 128], strides = [1, 1]} : vector<2x128xf32> to vector<1x128xf32>
    %cst_24 = arith.constant 5.120000e+02 : f32
    %51 = vector.broadcast %cst_24 : f32 to vector<1x128xf32>
    %52 = arith.divf %50, %51 : vector<1x128xf32>
    %53 = arith.mulf %49, %49 : vector<1x128xf32>
    %54 = arith.subf %52, %53 : vector<1x128xf32>
    %cst_25 = arith.constant 9.99999974E-6 : f32
    %55 = vector.broadcast %cst_25 : f32 to vector<1x128xf32>
    %56 = arith.addf %54, %55 : vector<1x128xf32>
    %57 = math.rsqrt %56 : vector<1x128xf32>
    %58 = arith.mulf %2, %57 : vector<1x128xf32>
    %59 = vector.broadcast %58 : vector<1x128xf32> to vector<32x128xf32>
    %60 = arith.mulf %39, %59 : vector<32x128xf32>
    %61 = arith.mulf %49, %58 : vector<1x128xf32>
    %62 = arith.subf %3, %61 : vector<1x128xf32>
    %63 = vector.broadcast %62 : vector<1x128xf32> to vector<32x128xf32>
    %64 = arith.addf %60, %63 : vector<32x128xf32>
    %cst_26 = arith.constant 0.000000e+00 : f32
    %65 = vector.broadcast %cst_26 : f32 to vector<32x128xf32>
    %66 = arith.cmpf ogt, %64, %65 : vector<32x128xf32>
    %cst_27 = arith.constant 1.000000e-01 : f32
    %67 = vector.broadcast %cst_27 : f32 to vector<32x128xf32>
    %68 = arith.mulf %67, %64 : vector<32x128xf32>
    %69 = arith.select %66, %64, %68 : vector<32x128xi1>, vector<32x128xf32>
    %c0_i32_28 = arith.constant 0 : i32
    %70 = vector.broadcast %c0_i32_28 : i32 to vector<32x1xi32>
    %71 = arith.cmpi eq, %22, %70 : vector<32x1xi32>
    %c1_i32_29 = arith.constant 1 : i32
    %72 = tpu.dynamic_rotate %69 by %c1_i32_29 dim 0 : vector<32x128xf32>, i32 -> vector<32x128xf32>
    %cst_30 = arith.constant 0.000000e+00 : f32
    %73 = vector.shape_cast %71 : vector<32x1xi1> to vector<32x1xi1>
    %74 = vector.broadcast %73 : vector<32x1xi1> to vector<32x128xi1>
    %75 = vector.broadcast %cst_30 : f32 to vector<32x128xf32>
    %76 = arith.select %74, %75, %72 : vector<32x128xi1>, vector<32x128xf32>
    %c15_i32_31 = arith.constant 15 : i32
    %77 = vector.broadcast %c15_i32_31 : i32 to vector<32x1xi32>
    %78 = arith.cmpi eq, %22, %77 : vector<32x1xi32>
    %c31_i32_32 = arith.constant 31 : i32
    %79 = tpu.dynamic_rotate %69 by %c31_i32_32 dim 0 : vector<32x128xf32>, i32 -> vector<32x128xf32>
    %cst_33 = arith.constant 0.000000e+00 : f32
    %80 = vector.shape_cast %78 : vector<32x1xi1> to vector<32x1xi1>
    %81 = vector.broadcast %80 : vector<32x1xi1> to vector<32x128xi1>
    %82 = vector.broadcast %cst_33 : f32 to vector<32x128xf32>
    %83 = arith.select %81, %82, %79 : vector<32x128xi1>, vector<32x128xf32>
    %84 = tpu.concatenate %76, %69, %83 in 1 : vector<32x128xf32>, vector<32x128xf32>, vector<32x128xf32> -> vector<32x384xf32>
    %c0_34 = arith.constant 0 : index
    %c0_35 = arith.constant 0 : index
    %85 = vector.load %arg2[%c0_34, %c0_35] : memref<384x128xf32, #tpu.memory_space<vmem>>, vector<384x128xf32>
    %cst_36 = arith.constant dense<0.000000e+00> : vector<32x128xf32>
    %86 = tpu.matmul %84, %85, %cst_36 {dimension_numbers = #tpu.dot_dimension_numbers<[1], [0], [0], [1], [0, 0, 1, 1], [], []>} : vector<32x384xf32>, vector<384x128xf32>, vector<32x128xf32> -> vector<32x128xf32>
    %cst_37 = arith.constant dense<0.000000e+00> : vector<128xf32>
    %87 = vector.multi_reduction <add>, %86, %cst_37 [0] : vector<32x128xf32> to vector<128xf32>
    %88 = vector.shape_cast %87 : vector<128xf32> to vector<1x128xf32>
    %89 = arith.mulf %86, %86 : vector<32x128xf32>
    %cst_38 = arith.constant dense<0.000000e+00> : vector<128xf32>
    %90 = vector.multi_reduction <add>, %89, %cst_38 [0] : vector<32x128xf32> to vector<128xf32>
    %91 = vector.shape_cast %90 : vector<128xf32> to vector<1x128xf32>
    %92 = tpu.concatenate %88, %91 in 0 : vector<1x128xf32>, vector<1x128xf32> -> vector<2x128xf32>
    %cst_39 = arith.constant dense<0.000000e+00> : vector<2x128xf32>
    %93 = tpu.matmul %92, %1, %cst_39 {dimension_numbers = #tpu.dot_dimension_numbers<[1], [0], [0], [1], [0, 0, 1, 1], [], []>} : vector<2x128xf32>, vector<128x128xf32>, vector<2x128xf32> -> vector<2x128xf32>
    %94 = vector.extract_strided_slice %93 {offsets = [0, 0], sizes = [1, 128], strides = [1, 1]} : vector<2x128xf32> to vector<1x128xf32>
    %cst_40 = arith.constant 5.120000e+02 : f32
    %95 = vector.broadcast %cst_40 : f32 to vector<1x128xf32>
    %96 = arith.divf %94, %95 : vector<1x128xf32>
    %97 = vector.extract_strided_slice %93 {offsets = [1, 0], sizes = [1, 128], strides = [1, 1]} : vector<2x128xf32> to vector<1x128xf32>
    %cst_41 = arith.constant 5.120000e+02 : f32
    %98 = vector.broadcast %cst_41 : f32 to vector<1x128xf32>
    %99 = arith.divf %97, %98 : vector<1x128xf32>
    %100 = arith.mulf %96, %96 : vector<1x128xf32>
    %101 = arith.subf %99, %100 : vector<1x128xf32>
    %cst_42 = arith.constant 9.99999974E-6 : f32
    %102 = vector.broadcast %cst_42 : f32 to vector<1x128xf32>
    %103 = arith.addf %101, %102 : vector<1x128xf32>
    %104 = math.rsqrt %103 : vector<1x128xf32>
    %105 = arith.mulf %4, %104 : vector<1x128xf32>
    %106 = vector.broadcast %105 : vector<1x128xf32> to vector<32x128xf32>
    %107 = arith.mulf %86, %106 : vector<32x128xf32>
    %108 = arith.mulf %96, %105 : vector<1x128xf32>
    %109 = arith.subf %5, %108 : vector<1x128xf32>
    %110 = vector.broadcast %109 : vector<1x128xf32> to vector<32x128xf32>
    %111 = arith.addf %107, %110 : vector<32x128xf32>
    %c0_43 = arith.constant 0 : index
    %c0_44 = arith.constant 0 : index
    %112 = vector.load %arg3[%c0_43, %c0_44] : memref<128x128xf32, #tpu.memory_space<vmem>>, vector<128x128xf32>
    %cst_45 = arith.constant dense<0.000000e+00> : vector<32x128xf32>
    %113 = tpu.matmul %0, %112, %cst_45 {dimension_numbers = #tpu.dot_dimension_numbers<[1], [0], [0], [1], [0, 0, 1, 1], [], []>} : vector<32x128xf32>, vector<128x128xf32>, vector<32x128xf32> -> vector<32x128xf32>
    %114 = arith.addf %111, %113 : vector<32x128xf32>
    %cst_46 = arith.constant 0.000000e+00 : f32
    %115 = vector.broadcast %cst_46 : f32 to vector<32x128xf32>
    %116 = arith.cmpf ogt, %114, %115 : vector<32x128xf32>
    %cst_47 = arith.constant 1.000000e-01 : f32
    %117 = vector.broadcast %cst_47 : f32 to vector<32x128xf32>
    %118 = arith.mulf %117, %114 : vector<32x128xf32>
    %119 = arith.select %116, %114, %118 : vector<32x128xi1>, vector<32x128xf32>
    %c0_48 = arith.constant 0 : index
    %c0_49 = arith.constant 0 : index
    %120 = vector.load %arg9[%c0_48, %c0_49] : memref<32x128xf32, #tpu.memory_space<vmem>>, vector<32x128xf32>
    tpu.vector_store %arg9[%c0_48, %c0_49], %119 {strides = array<i32>} : memref<32x128xf32, #tpu.memory_space<vmem>>, vector<32x128xf32>,
    return
  }
}

</mosaic_0001>

<bundles_post_ra>
// kernel: tpu_custom_call.1
= control target key start
LH: loop header
LB: loop body
LE: loop exit
PB: predicated region body
PF: predicated region fallthrough
CT: control target
= control target key end

     0   :  { %14 = vsyncpa [#allocation3], 0  ;;  %s1998_s0 = inlined_call_operand.hbm [shape: f32[32,128], index: 0, kind: input, shape index: {}]   ;;  %s1999_s1 = inlined_call_operand.hbm [shape: f32[384,128], index: 1, kind: input, shape index: {}]   ;;  %s2000_s2 = inlined_call_operand.hbm [shape: f32[384,128], index: 2, kind: input, shape index: {}]   ;;  %s2001_s3 = inlined_call_operand.hbm [shape: f32[128,128], index: 3, kind: input, shape index: {}]   ;;  %s2002_s4 = inlined_call_operand.hbm [shape: f32[128,128], index: 4, kind: input, shape index: {}]   ;;  %s2003_s5 = inlined_call_operand.vmem [shape: f32[1,128], index: 5, kind: input, shape index: {}]   ;;  %s2004_s6 = inlined_call_operand.vmem [shape: f32[1,128], index: 6, kind: input, shape index: {}]   ;;  %s2005_s7 = inlined_call_operand.vmem [shape: f32[1,128], index: 7, kind: input, shape index: {}]   ;;  %s2006_s8 = inlined_call_operand.vmem [shape: f32[1,128], index: 8, kind: input, shape index: {}]   ;;  %s2007_s9 = inlined_call_operand.hbm [shape: f32[32,128], index: 9, kind: output, shape index: {}]  }
   0x1   :  { %15 = vsyncpa [#allocation6], 0 }
   0x2   :  { %16 = vsyncpa [#allocation9], 0 }
   0x3   :  { %17 = vsyncpa [#allocation4], 0  ;;  %s1653_s30 = smov [#allocation5]   ;;  %s1654_s11 = smov [#allocation8]  }
   0x4   :  { %s35_s10 = sshll.u32 %s1653_s30, 4  ;;  %s59_s12 = sshll.u32 %s1654_s11, 4  ;;  %s36_s10 = int_to_ptr.vmem [resolvable:$true] %s35_s10  ;;  %s60_s12 = int_to_ptr.vmem [resolvable:$true] %s59_s12 }
   0x5   :  { %s1533_s13 = scalar_lea.vmem %s36_s10, 6144  ;;  %p1538_p1 = scmp.lt.s32.totalorder %s36_s10, %s36_s10 }
   0x6   :  { %p1534_p0 = scmp.ne.s32.totalorder %s36_s10, %s1533_s13  ;;  %p1539_p2 = scmp.lt.s32.totalorder %s1533_s13, %s1533_s13 }
   0x8   :  { %p1540_p3 = por %p1539_p2, %p1538_p1 }
   0xa   :  { %p1541_p4 = pnand %p1540_p3, %p1534_p0 }
   0xc   :  { %1544 = shalt.err (!%p1541_p4)
}
   0xd   :  { %s1655_s14 = smov 128   ;;  %s1656_s15 = smov 8  }
   0xe   :  { %41 = dma.hbm_to_vmem [thread:$0]  %s1999_s1, 6144, %s36_s10, [#allocation6], %s1655_s14, %s1655_s14, %s1656_s15  }
   0xf   :  { %s1553_s18 = scalar_lea.vmem %s60_s12, 2048  ;;  %p1558_p6 = scmp.lt.s32.totalorder %s60_s12, %s60_s12 }
  0x10   :  { %p1554_p5 = scmp.ne.s32.totalorder %s60_s12, %s1553_s18  ;;  %p1559_p7 = scmp.lt.s32.totalorder %s1553_s18, %s1553_s18 }
  0x12   :  { %p1560_p8 = por %p1559_p7, %p1558_p6 }
  0x14   :  { %p1561_p9 = pnand %p1560_p8, %p1554_p5 }
  0x16   :  { %1564 = shalt.err (!%p1561_p9)
}
  0x17   :  { %65 = dma.hbm_to_vmem [thread:$0]  %s2001_s3, 2048, %s60_s12, [#allocation9], %s1655_s14, %s1655_s14, %s1656_s15  }
  0x18   :  { %s1657_s21 = smov [#allocation2]   ;;  %s1658_s23 = smov [#allocation7]  }
  0x19   :  { %s23_s22 = sshll.u32 %s1657_s21, 4  ;;  %s47_s24 = sshll.u32 %s1658_s23, 4  ;;  %s24_s22 = int_to_ptr.vmem [resolvable:$true] %s23_s22  ;;  %s48_s24 = int_to_ptr.vmem [resolvable:$true] %s47_s24 }
  0x1a   :  { %s1573_s1 = scalar_lea.vmem %s24_s22, 512  ;;  %p1578_p11 = scmp.lt.s32.totalorder %s24_s22, %s24_s22 }
  0x1b   :  { %p1574_p10 = scmp.ne.s32.totalorder %s24_s22, %s1573_s1  ;;  %p1579_p12 = scmp.lt.s32.totalorder %s1573_s1, %s1573_s1 }
  0x1d   :  { %p1580_p13 = por %p1579_p12, %p1578_p11 }
  0x1f   :  { %p1581_p0 = pnand %p1580_p13, %p1574_p10 }
  0x21   :  { %1584 = shalt.err (!%p1581_p0)
}
  0x22   :  { %29 = dma.hbm_to_vmem [thread:$0]  %s1998_s0, 512, %s24_s22, [#allocation3], %s1655_s14, %s1655_s14, %s1656_s15  }
  0x23   :  { %s1593_s3 = scalar_lea.vmem %s48_s24, 6144  ;;  %p1598_p2 = scmp.lt.s32.totalorder %s48_s24, %s48_s24 }
  0x24   :  { %p1594_p1 = scmp.ne.s32.totalorder %s48_s24, %s1593_s3  ;;  %p1599_p3 = scmp.lt.s32.totalorder %s1593_s3, %s1593_s3 }
  0x26   :  { %p1600_p4 = por %p1599_p3, %p1598_p2 }
  0x28   :  { %p1601_p5 = pnand %p1600_p4, %p1594_p1 }
  0x2a   :  { %1604 = shalt.err (!%p1601_p5)
}
  0x2b   :  { %53 = dma.hbm_to_vmem [thread:$0]  %s2000_s2, 6144, %s48_s24, [#allocation6], %s1655_s14, %s1655_s14, %s1656_s15  }
  0x2c   :  { %s1659_s29 = smov [#allocation10]  }
  0x2d   :  { %s71_s30 = sshll.u32 %s1659_s29, 4  ;;  %s72_s30 = int_to_ptr.vmem [resolvable:$true] %s71_s30 }
  0x2e   :  { %s1613_s10 = scalar_lea.vmem %s72_s30, 2048  ;;  %p1618_p7 = scmp.lt.s32.totalorder %s72_s30, %s72_s30 }
  0x2f   :  { %p1614_p6 = scmp.ne.s32.totalorder %s72_s30, %s1613_s10  ;;  %p1619_p8 = scmp.lt.s32.totalorder %s1613_s10, %s1613_s10 }
  0x31   :  { %p1620_p9 = por %p1619_p8, %p1618_p7 }
  0x33   :  { %p1621_p10 = pnand %p1620_p9, %p1614_p6 }
  0x35   :  { %1624 = shalt.err (!%p1621_p10)
}
  0x36   :  { %77 = dma.hbm_to_vmem [thread:$0]  %s2002_s4, 2048, %s72_s30, [#allocation9], %s1655_s14, %s1655_s14, %s1656_s15  }
  0x37   :  { %1645 = dma.done.wait [#allocation3], 512  }
  0x38   :  { %1646 = vsyncadd [#allocation3], 4294966784 }
  0x39   :  { %1647 = dma.done.wait [#allocation6], 12288  }
  0x3a   :  { %1648 = vsyncadd [#allocation6], 4294955008 }
  0x3b   :  { %1649 = dma.done.wait [#allocation9], 4096  }
  0x3c   :  { %1650 = vsyncadd [#allocation9], 4294963200  ;;  %v259_v0 = vld [vmem:[#allocation5 + $0xf8] sm:$0xff]  ;;  %v258_v2 = vld [vmem:[#allocation5 + $0xf0] sm:$0xff]  ;;  %v125_v22 = vlaneseq  ;;  %vm1661_vm6 = vmmov 0   ;;  %vm468_vm7 = vcmask 1040384  }
  0x3d   :  { %v243_v1 = vld [vmem:[#allocation5 + $0x78] sm:$0xff]  ;;  %1144 = vmatprep.subr.mxu1 %v259_v0  ;;  %v242_v3 = vld [vmem:[#allocation5 + $0x70] sm:$0xff]  ;;  %v257_v4 = vld [vmem:[#allocation5 + $0xe8] sm:$0xff] }
  0x3e   :  { %1145 = vmatpush3.msra.mxu1 %v243_v1  ;;  %v241_v5 = vld [vmem:[#allocation5 + $0x68] sm:$0xff]  ;;  %v256_v6 = vld [vmem:[#allocation5 + $0xe0] sm:$0xff]  ;;  %v255_v8 = vld [vmem:[#allocation5 + $0xd8] sm:$0xff]  ;;  %v1747_v27 = vshrl.u32 %v125_v22, 7 }
  0x3f   :  { %1146 = vmatprep.subr.mxu1 %v258_v2  ;;  %v240_v7 = vld [vmem:[#allocation5 + $0x60] sm:$0xff]  ;;  %v239_v9 = vld [vmem:[#allocation5 + $0x58] sm:$0xff]  ;;  %v254_v10 = vld [vmem:[#allocation5 + $0xd0] sm:$0xff] }
  0x40   :  { %1147 = vmatpush3.msra.mxu1 %v242_v3  ;;  %v238_v11 = vld [vmem:[#allocation5 + $0x50] sm:$0xff]  ;;  %v253_v12 = vld [vmem:[#allocation5 + $0xc8] sm:$0xff]  ;;  %v1744_v13 = vld [vmem:[#allocation2] sm:$0xff]  ;;  %v134_v34 = vand.u32 15, %v1747_v27  ;;  %vm186_vm0 = vcmp.lt.s32.totalorder %v1747_v27, 1  ;;  %v128_v44 = vadd.s32 16, %v1747_v27 }
  0x41   :  { %1148 = vmatprep.subr.mxu1 %v257_v4  ;;  %v237_v14 = vld [vmem:[#allocation5 + $0x48] sm:$0xff]  ;;  %340 = vmatprep.mubr.f32.mxu1 %v1744_v13  ;;  %v252_v15 = vld [vmem:[#allocation5 + $0xc0] sm:$0xff]  ;;  %v251_v17 = vld [vmem:[#allocation5 + $0xb8] sm:$0xff]  ;;  %v182_v33 = vrot.slane %v1744_v13, 7  ;;  %v207_v55 = vrot.slane %v1744_v13, 1  ;;  %vm211_vm3 = vcmp.lt.s32.totalorder %v1747_v27, 7 }
  0x42   :  { %1149 = vmatpush3.msra.mxu1 %v241_v5  ;;  %v236_v16 = vld [vmem:[#allocation5 + $0x40] sm:$0xff]  ;;  %v235_v18 = vld [vmem:[#allocation5 + $0x38] sm:$0xff]  ;;  %v250_v19 = vld [vmem:[#allocation5 + $0xb0] sm:$0xff]  ;;  %vm1759_vm1 = vcmp.ne.s32.totalorder %v134_v34, 0  ;;  %v148_v50 = vand.u32 15, %v128_v44  ;;  %v127_v3 = vadd.s32 8, %v1747_v27 }
  0x43   :  { %1150 = vmatprep.subr.mxu1 %v256_v6  ;;  %v234_v20 = vld [vmem:[#allocation5 + $0x30] sm:$0xff]  ;;  %v249_v21 = vld [vmem:[#allocation5 + $0xa8] sm:$0xff]  ;;  %v248_v24 = vld [vmem:[#allocation5 + $0xa0] sm:$0xff] }
  0x44   :  { %1151 = vmatpush3.msra.mxu1 %v240_v7  ;;  %v233_v23 = vld [vmem:[#allocation5 + $0x28] sm:$0xff]  ;;  %v232_v25 = vld [vmem:[#allocation5 + $0x20] sm:$0xff]  ;;  %v247_v26 = vld [vmem:[#allocation5 + $0x98] sm:$0xff]  ;;  %vm1776_vm2 = vcmp.ne.s32.totalorder %v148_v50, 0  ;;  %v141_v7 = vand.u32 15, %v127_v3 }
  0x45   :  { %1152 = vmatprep.subr.mxu1 %v255_v8  ;;  %v231_v28 = vld [vmem:[#allocation5 + $0x18] sm:$0xff]  ;;  %v246_v30 = vld [vmem:[#allocation5 + $0x90] sm:$0xff]  ;;  %v245_v32 = vld [vmem:[#allocation5 + $0x88] sm:$0xff]  ;;  %v129_v8 = vadd.s32 24, %v1747_v27 }
  0x46   :  { %1153 = vmatpush3.msra.mxu1 %v239_v9  ;;  %v1749_v29 = vld [vmem:[#allocation2 + $0x18] sm:$0xff]  ;;  %v230_v31 = vld [vmem:[#allocation5 + $0x10] sm:$0xff]  ;;  %v229_v36 = vld [vmem:[#allocation5 + $0x8] sm:$0xff]  ;;  %vm1796_vm4 = vcmp.ne.s32.totalorder %v141_v7, 15 }
  0x47   :  { %1154 = vmatprep.subr.mxu1 %v254_v10  ;;  %v185_v35 = vrot.slane %v1749_v29, 7  ;;  %v1755_v37 = vld [vmem:[#allocation2 + $0x8] sm:$0xff]  ;;  %v244_v38 = vld [vmem:[#allocation5 + $0x80] sm:$0xff]  ;;  %v275_v42 = vld [vmem:[#allocation5 + $0x178] sm:$0xff]  ;;  %v210_v9 = vrot.slane %v1749_v29, 1 }
  0x48   :  { %1155 = vmatpush3.msra.mxu1 %v238_v11  ;;  %v228_v39 = vld [vmem:[#allocation5] sm:$0xff]  ;;  %v183_v43 = vrot.slane %v1755_v37, 7  ;;  %v1765_v45 = vld [vmem:[#allocation2 + $0x10] sm:$0xff]  ;;  %v273_v47 = vld [vmem:[#allocation5 + $0x168] sm:$0xff]  ;;  %v208_v56 = vrot.slane %v1755_v37, 1 }
  0x49   :  { %1156 = vmatprep.subr.mxu1 %v253_v12  ;;  %v190_v40 = vsel %vm186_vm0, %v185_v35, %v182_v33  ;;  %v274_v46 = vld [vmem:[#allocation5 + $0x170] sm:$0xff]  ;;  %v184_v49 = vrot.slane %v1765_v45, 7  ;;  %v272_v51 = vld [vmem:[#allocation5 + $0x160] sm:$0xff]  ;;  %v271_v52 = vld [vmem:[#allocation5 + $0x158] sm:$0xff]  ;;  %v209_v5 = vrot.slane %v1765_v45, 1 }
  0x4a   :  { %1157 = vmatpush3.msra.mxu1 %v237_v14  ;;  %v189_v48 = vsel %vm186_vm0, %v182_v33, %v183_v43  ;;  %v270_v57 = vld [vmem:[#allocation5 + $0x150] sm:$0xff]  ;;  %v269_v58 = vld [vmem:[#allocation5 + $0x148] sm:$0xff]  ;;  %v214_v60 = vsel %vm211_vm3, %v207_v55, %v208_v56  ;;  %v268_v61 = vld [vmem:[#allocation5 + $0x140] sm:$0xff]  ;;  %v155_v14 = vand.u32 15, %v129_v8 }
  0x4b   :  { %1158 = vmatprep.subr.mxu1 %v252_v15  ;;  %v188_v53 = vsel %vm186_vm0, %v183_v43, %v184_v49  ;;  %v187_v59 = vsel %vm186_vm0, %v184_v49, %v185_v35  ;;  %v267_v62 = vld [vmem:[#allocation5 + $0x138] sm:$0xff]  ;;  %v266_v63 = vld [vmem:[#allocation5 + $0x130] sm:$0xff]  ;;  %v265_v0 = vld [vmem:[#allocation5 + $0x128] sm:$0xff]  ;;  %v213_v11 = vsel %vm211_vm3, %v208_v56, %v209_v5  ;;  %v212_v15 = vsel %vm211_vm3, %v209_v5, %v210_v9 }
  0x4c   :  { %1159 = vmatpush3.msra.mxu1 %v236_v16  ;;  %v264_v1 = vld [vmem:[#allocation5 + $0x120] sm:$0xff]  ;;  %v263_v2 = vld [vmem:[#allocation5 + $0x118] sm:$0xff]  ;;  %v262_v4 = vld [vmem:[#allocation5 + $0x110] sm:$0xff]  ;;  %v215_v16 = vsel %vm211_vm3, %v210_v9, %v207_v55  ;;  %vm1806_vm5 = vcmp.ne.s32.totalorder %v155_v14, 15 }
  0x4d   :  { %1160 = vmatprep.subr.mxu1 %v251_v17  ;;  %v261_v6 = vld [vmem:[#allocation5 + $0x108] sm:$0xff]  ;;  %v260_v10 = vld [vmem:[#allocation5 + $0x100] sm:$0xff]  ;;  %v1861_v33 = vld [vmem:[#allocation10 + $0x18] sm:$0xff] }
  0x4e   :  { %1161 = vmatpush3.msra.mxu1 %v235_v18  ;;  %v1812_v18 = vld [vmem:[#allocation10 + $0x78] sm:$0xff]  ;;  %v1825_v22 = vld [vmem:[#allocation10 + $0x60] sm:$0xff]  ;;  %v1865_v34 = vld [vmem:[#allocation10 + $0x10] sm:$0xff] }
  0x4f   :  { %1162 = vmatprep.subr.mxu1 %v250_v19  ;;  %v1660_v19 = vmov 0.0   ;;  %v1869_v35 = vld [vmem:[#allocation10 + $0x8] sm:$0xff] }
  0x50   :  { %1163 = vmatpush3.msra.mxu1 %v234_v20  ;;  %1364 = vmatprep.subr.mxu0 %v1660_v19  ;;  %v1815_v20 = vld [vmem:[#allocation10 + $0x70] sm:$0xff]  ;;  %v997_v54 = vld [vmem:[#allocation8 + $0x68] sm:$0xff] }
  0x51   :  { %1164 = vmatprep.subr.mxu1 %v249_v21  ;;  %1365 = vmatpush3.msra.mxu0 %v1812_v18  ;;  %v1821_v21 = vld [vmem:[#allocation10 + $0x68] sm:$0xff] }
  0x52   :  { %1165 = vmatpush3.msra.mxu1 %v233_v23  ;;  %1366 = vmatprep.subr.mxu0 %v1660_v19  ;;  %v1829_v23 = vld [vmem:[#allocation10 + $0x58] sm:$0xff] }
  0x53   :  { %1166 = vmatprep.subr.mxu1 %v248_v24  ;;  %1367 = vmatpush3.msra.mxu0 %v1815_v20  ;;  %v1833_v24 = vld [vmem:[#allocation10 + $0x50] sm:$0xff] }
  0x54   :  { %1167 = vmatpush3.msra.mxu1 %v232_v25  ;;  %1368 = vmatprep.subr.mxu0 %v1660_v19  ;;  %v1837_v25 = vld [vmem:[#allocation10 + $0x48] sm:$0xff] }
  0x55   :  { %1168 = vmatprep.subr.mxu1 %v247_v26  ;;  %1369 = vmatpush3.msra.mxu0 %v1821_v21  ;;  %v1841_v26 = vld [vmem:[#allocation10 + $0x40] sm:$0xff] }
  0x56   :  { %1169 = vmatpush3.msra.mxu1 %v231_v28  ;;  %1370 = vmatprep.subr.mxu0 %v1660_v19  ;;  %v1845_v28 = vld [vmem:[#allocation10 + $0x38] sm:$0xff] }
  0x57   :  { %1170 = vmatprep.subr.mxu1 %v246_v30  ;;  %1371 = vmatpush3.msra.mxu0 %v1825_v22  ;;  %v1849_v30 = vld [vmem:[#allocation10 + $0x30] sm:$0xff] }
  0x58   :  { %1171 = vmatpush3.msra.mxu1 %v230_v31  ;;  %1372 = vmatprep.subr.mxu0 %v1660_v19  ;;  %v1852_v31 = vld [vmem:[#allocation10 + $0x28] sm:$0xff] }
  0x59   :  { %1172 = vmatprep.subr.mxu1 %v245_v32  ;;  %1373 = vmatpush3.msra.mxu0 %v1829_v23  ;;  %v1855_v32 = vld [vmem:[#allocation10 + $0x20] sm:$0xff] }
  0x5a   :  { %1173 = vmatpush3.msra.mxu1 %v229_v36  ;;  %1374 = vmatprep.subr.mxu0 %v1660_v19  ;;  %v1873_v36 = vld [vmem:[#allocation10] sm:$0xff] }
  0x5b   :  { %1174 = vmatprep.subr.mxu1 %v244_v38  ;;  %1375 = vmatpush3.msra.mxu0 %v1833_v24 }
  0x5c   :  { %1175 = vmatpush3.msra.mxu1 %v228_v39  ;;  %1376 = vmatprep.subr.mxu0 %v1660_v19 }
  0x5d   :  { %1125 = vmatmul.mubr.msk.f32.vlgmr.msra.gmra.mxu1 %vm1759_vm1, %v190_v40  ;;  %1326 = vmatprep.subr.mxu1 %v275_v42 }
  0x5e   :  { %1327 = vmatpush3.msra.mxu1 %v275_v42  ;;  %345 = vmatprep.mubr.f32.mxu1 %v1755_v37 }
  0x5f   :  { %1328 = vmatprep.subr.mxu1 %v274_v46  ;;  %1377 = vmatpush3.msra.mxu0 %v1837_v25 }
  0x60   :  { %1329 = vmatpush3.msra.mxu1 %v274_v46  ;;  %1378 = vmatprep.subr.mxu0 %v1660_v19 }
  0x61   :  { %1330 = vmatprep.subr.mxu1 %v273_v47  ;;  %346 = vmatmul.mubr.f32.gmra.mxu1 %v189_v48 }
  0x62   :  { %1331 = vmatpush3.msra.mxu1 %v273_v47  ;;  %350 = vmatprep.mubr.f32.mxu1 %v1765_v45 }
  0x63   :  { %1332 = vmatprep.subr.mxu1 %v272_v51  ;;  %1379 = vmatpush3.msra.mxu0 %v1841_v26 }
  0x64   :  { %1333 = vmatpush3.msra.mxu1 %v272_v51  ;;  %1380 = vmatprep.subr.mxu0 %v1660_v19 }
  0x65   :  { %1334 = vmatprep.subr.mxu1 %v271_v52  ;;  %1127 = vmatmul.mubr.msk.f32.gmra.mxu1 %vm1776_vm2, %v188_v53 }
  0x66   :  { %1335 = vmatpush3.msra.mxu1 %v271_v52  ;;  %355 = vmatprep.mubr.f32.mxu1 %v1749_v29 }
  0x67   :  { %1336 = vmatprep.subr.mxu1 %v270_v57  ;;  %1381 = vmatpush3.msra.mxu0 %v1845_v28 }
  0x68   :  { %1337 = vmatpush3.msra.mxu1 %v270_v57  ;;  %1382 = vmatprep.subr.mxu0 %v1660_v19 }
  0x69   :  { %1338 = vmatprep.subr.mxu1 %v269_v58  ;;  %356 = vmatmul.mubr.f32.gmra.mxu1 %v187_v59 }
  0x6a   :  { %1339 = vmatpush3.msra.mxu1 %v269_v58  ;;  %1358 = vmatprep.mubr.f32.mxu1 %v214_v60 }
  0x6b   :  { %1340 = vmatprep.subr.mxu1 %v268_v61  ;;  %1383 = vmatpush3.msra.mxu0 %v1849_v30 }
  0x6c   :  { %1341 = vmatpush3.msra.mxu1 %v268_v61  ;;  %1384 = vmatprep.subr.mxu0 %v1660_v19 }
  0x6d   :  { %1342 = vmatprep.subr.mxu1 %v267_v62  ;;  %1396 = vmatprep.mubr.msk.f32.mxu0 %vm1661_vm6, %v1660_v19 }
  0x6e   :  { %1343 = vmatpush3.msra.mxu1 %v267_v62  ;;  %1385 = vmatpush3.msra.mxu0 %v1852_v31 }
  0x6f   :  { %1344 = vmatprep.subr.mxu1 %v266_v63  ;;  %1386 = vmatprep.subr.mxu0 %v1660_v19 }
  0x70   :  { %1345 = vmatpush3.msra.mxu1 %v266_v63  ;;  %1387 = vmatpush3.msra.mxu0 %v1855_v32 }
  0x71   :  { %1346 = vmatprep.subr.mxu1 %v265_v0  ;;  %1388 = vmatprep.subr.mxu0 %v1660_v19 }
  0x72   :  { %1347 = vmatpush3.msra.mxu1 %v265_v0  ;;  %1389 = vmatpush3.msra.mxu0 %v1861_v33 }
  0x73   :  { %1348 = vmatprep.subr.mxu1 %v264_v1  ;;  %1390 = vmatprep.subr.mxu0 %v1660_v19 }
  0x74   :  { %1349 = vmatpush3.msra.mxu1 %v264_v1  ;;  %1391 = vmatpush3.msra.mxu0 %v1865_v34 }
  0x75   :  { %1350 = vmatprep.subr.mxu1 %v263_v2  ;;  %1392 = vmatprep.subr.mxu0 %v1660_v19 }
  0x76   :  { %1351 = vmatpush3.msra.mxu1 %v263_v2  ;;  %1393 = vmatpush3.msra.mxu0 %v1869_v35 }
  0x77   :  { %1352 = vmatprep.subr.mxu1 %v262_v4  ;;  %1394 = vmatprep.subr.mxu0 %v1660_v19 }
  0x78   :  { %1353 = vmatpush3.msra.mxu1 %v262_v4  ;;  %1395 = vmatpush3.msra.mxu0 %v1873_v36 }
  0x79   :  { %1354 = vmatprep.subr.mxu1 %v261_v6 }
  0x7a   :  { %1355 = vmatpush3.msra.mxu1 %v261_v6 }
  0x7b   :  { %1356 = vmatprep.subr.mxu1 %v260_v10 }
  0x7c   :  { %1357 = vmatpush3.msra.mxu1 %v260_v10 }
  0x7d   :  { %1359 = vmatmul.mubr.msk.f32.vlgmr.msra.gmra.mxu1 %vm1796_vm4, %v213_v11 }
  0x7e   :  { %1361 = vmatprep.mubr.f32.mxu1 %v212_v15 }
  0x81   :  { %1362 = vmatmul.mubr.msk.f32.gmra.mxu1 %vm1806_vm5, %v215_v16 }
 0x11d   :  { %v1176_v38 = vpop.f32.mrf.mxu1 }
 0x11f   :  { %v1177_v39 = vpop.f32.mrf.mxu1 }
 0x120   :  { %v1178_v49 = vadd.f32 %v1177_v39, %v1176_v38 }
 0x121   :  { %v1179_v40 = vpop.f32.mrf.mxu1 }
 0x123   :  { %v1180_v42 = vpop.f32.mrf.mxu1 }
 0x124   :  { %v1181_v50 = vadd.f32 %v1180_v42, %v1179_v40 }
 0x125   :  { %v1182_v43 = vpop.f32.mrf.mxu1 }
 0x127   :  { %v1183_v44 = vpop.f32.mrf.mxu1 }
 0x128   :  { %v1184_v56 = vadd.f32 %v1183_v44, %v1182_v43  ;;  %v656_v44 = vld [vmem:[#allocation7 + $0xf8] sm:$0xff] }
 0x129   :  { %v1185_v46 = vpop.f32.mrf.mxu1  ;;  %1225 = vmatprep.subr.mxu1 %v656_v44  ;;  %v629_v44 = vld [vmem:[#allocation7 + $0x20] sm:$0xff] }
 0x12b   :  { %v1186_v47 = vpop.f32.mrf.mxu1 }
 0x12c   :  { %v1187_v57 = vadd.f32 %v1186_v47, %v1185_v46  ;;  %v640_v46 = vld [vmem:[#allocation7 + $0x78] sm:$0xff] }
 0x12d   :  { %v672_v47 = vld [vmem:[#allocation7 + $0x178] sm:$0xff]  ;;  %1226 = vmatpush3.msra.mxu1 %v640_v46  ;;  %v661_v46 = vld [vmem:[#allocation7 + $0x120] sm:$0xff] }
 0x12e   :  { %1399 = vmatprep.subr.mxu0 %v672_v47 }
 0x13d   :  { %v1360_v48 = vpop.f32.mrf.mxu1 }
 0x13e   :  { %v1878_v52 = vadd.f32 %v1360_v48, %v1181_v50  ;;  %v655_v48 = vld [vmem:[#allocation7 + $0xf0] sm:$0xff] }
 0x13f   :  { %v427_v51 = vpop.f32.mrf.mxu1  ;;  %1227 = vmatprep.subr.mxu1 %v655_v48  ;;  %v671_v50 = vld [vmem:[#allocation7 + $0x170] sm:$0xff]  ;;  %v628_v48 = vld [vmem:[#allocation7 + $0x18] sm:$0xff] }
 0x140   :  { %v1880_v53 = vadd.f32 %v1178_v49, %v427_v51  ;;  %v456_v60 = vmul.f32 %v1878_v52, %v1878_v52  ;;  %v639_v49 = vld [vmem:[#allocation7 + $0x70] sm:$0xff]  ;;  %v654_v51 = vld [vmem:[#allocation7 + $0xe8] sm:$0xff] }
 0x141   :  { %v1363_v55 = vpop.f32.mrf.mxu1  ;;  %1228 = vmatpush3.msra.mxu1 %v639_v49  ;;  %v660_v49 = vld [vmem:[#allocation7 + $0x118] sm:$0xff] }
 0x142   :  { %v455_v58 = vmul.f32 %v1880_v53, %v1880_v53  ;;  %v446_v61 = vadd.f32 %v1878_v52, %v1880_v53  ;;  %v1888_v62 = vadd.f32 %v1363_v55, %v1187_v57  ;;  %1229 = vmatprep.subr.mxu1 %v654_v51  ;;  %v638_v55 = vld [vmem:[#allocation7 + $0x68] sm:$0xff]  ;;  %v653_v57 = vld [vmem:[#allocation7 + $0xe0] sm:$0xff]  ;;  %v627_v51 = vld [vmem:[#allocation7 + $0x10] sm:$0xff] }
 0x143   :  { %v437_v59 = vpop.f32.mrf.mxu1  ;;  %1230 = vmatpush3.msra.mxu1 %v638_v55  ;;  %v659_v55 = vld [vmem:[#allocation7 + $0x110] sm:$0xff] }
 0x144   :  { %v1890_v63 = vadd.f32 %v1184_v56, %v437_v59  ;;  %v459_v0 = vadd.f32 %v456_v60, %v455_v58  ;;  %v458_v3 = vmul.f32 %v1888_v62, %v1888_v62  ;;  %v670_v56 = vld [vmem:[#allocation7 + $0x168] sm:$0xff]  ;;  %1231 = vmatprep.subr.mxu1 %v653_v57  ;;  %v637_v58 = vld [vmem:[#allocation7 + $0x60] sm:$0xff]  ;;  %v652_v60 = vld [vmem:[#allocation7 + $0xd8] sm:$0xff] }
 0x145   :  { %v669_v59 = vld [vmem:[#allocation7 + $0x160] sm:$0xff]  ;;  %1232 = vmatpush3.msra.mxu1 %v637_v58  ;;  %v626_v57 = vld [vmem:[#allocation7 + $0x8] sm:$0xff] }
 0x146   :  { %v447_v1 = vadd.f32 %v446_v61, %v1890_v63  ;;  %v457_v2 = vmul.f32 %v1890_v63, %v1890_v63  ;;  %1233 = vmatprep.subr.mxu1 %v652_v60  ;;  %v636_v61 = vld [vmem:[#allocation7 + $0x58] sm:$0xff]  ;;  %v658_v58 = vld [vmem:[#allocation7 + $0x108] sm:$0xff]  ;;  %v625_v60 = vld [vmem:[#allocation7] sm:$0xff] }
 0x147   :  { %1234 = vmatpush3.msra.mxu1 %v636_v61  ;;  %v657_v61 = vld [vmem:[#allocation7 + $0x100] sm:$0xff] }
 0x148   :  { %v448_v4 = vadd.f32 %v447_v1, %v1888_v62  ;;  %v460_v5 = vadd.f32 %v459_v0, %v457_v2  ;;  %v668_v0 = vld [vmem:[#allocation7 + $0x158] sm:$0xff]  ;;  %v651_v1 = vld [vmem:[#allocation7 + $0xd0] sm:$0xff] }
 0x149   :  { %1235 = vmatprep.subr.mxu1 %v651_v1  ;;  %v635_v2 = vld [vmem:[#allocation7 + $0x50] sm:$0xff] }
 0x14a   :  { %v449_v6 = vrot.slane %v448_v4, 4  ;;  %v461_v7 = vadd.f32 %v460_v5, %v458_v3  ;;  %v667_v3 = vld [vmem:[#allocation7 + $0x150] sm:$0xff]  ;;  %1236 = vmatpush3.msra.mxu1 %v635_v2  ;;  %v634_v5 = vld [vmem:[#allocation7 + $0x48] sm:$0xff] }
 0x14c   :  { %v450_v8 = vadd.f32 %v449_v6, %v448_v4  ;;  %v462_v9 = vrot.slane %v461_v7, 4  ;;  %v650_v4 = vld [vmem:[#allocation7 + $0xc8] sm:$0xff] }
 0x14d   :  { %1237 = vmatprep.subr.mxu1 %v650_v4  ;;  %v666_v6 = vld [vmem:[#allocation7 + $0x148] sm:$0xff] }
 0x14e   :  { %v451_v10 = vrot.slane %v450_v8, 2  ;;  %v463_v11 = vadd.f32 %v462_v9, %v461_v7  ;;  %1238 = vmatpush3.msra.mxu1 %v634_v5  ;;  %v649_v7 = vld [vmem:[#allocation7 + $0xc0] sm:$0xff] }
 0x14f   :  { %1239 = vmatprep.subr.mxu1 %v649_v7  ;;  %v665_v9 = vld [vmem:[#allocation7 + $0x140] sm:$0xff]  ;;  %v1662_v7 = vmov 1966171168  }
 0x150   :  { %v452_v14 = vadd.f32 %v451_v10, %v450_v8  ;;  %v464_v15 = vrot.slane %v463_v11, 2  ;;  %v633_v8 = vld [vmem:[#allocation7 + $0x40] sm:$0xff]  ;;  %v648_v10 = vld [vmem:[#allocation7 + $0xb8] sm:$0xff] }
 0x151   :  { %1240 = vmatpush3.msra.mxu1 %v633_v8  ;;  %v551_v8 = vunpack.c.l.s4 %v1662_v7 }
 0x152   :  { %v453_v16 = vrot.slane %v452_v14, 1  ;;  %v465_v38 = vadd.f32 %v464_v15, %v463_v11  ;;  %1241 = vmatprep.subr.mxu1 %v648_v10  ;;  %v632_v11 = vld [vmem:[#allocation7 + $0x38] sm:$0xff]  ;;  %v647_v15 = vld [vmem:[#allocation7 + $0xb0] sm:$0xff] }
 0x153   :  { %1242 = vmatpush3.msra.mxu1 %v632_v11 }
 0x154   :  { %v466_v39 = vrot.slane %v465_v38, 1  ;;  %v454_v40 = vadd.f32 %v453_v16, %v452_v14  ;;  %v664_v14 = vld [vmem:[#allocation7 + $0x138] sm:$0xff]  ;;  %1243 = vmatprep.subr.mxu1 %v647_v15  ;;  %v631_v16 = vld [vmem:[#allocation7 + $0x30] sm:$0xff] }
 0x155   :  { %1244 = vmatpush3.msra.mxu1 %v631_v16  ;;  %v121_v16 = vld [vmem:[%s2003_s5] sm:$0x1] }
 0x156   :  { %v467_v42 = vadd.f32 %v466_v39, %v465_v38  ;;  %v663_v38 = vld [vmem:[#allocation7 + $0x130] sm:$0xff]  ;;  %v646_v39 = vld [vmem:[#allocation7 + $0xa8] sm:$0xff] }
 0x157   :  { %1245 = vmatprep.subr.mxu1 %v646_v39  ;;  %v1909_v39 = vsub.s32 0, %v1747_v27 }
 0x158   :  { %v469_v43 = vsel %vm468_vm7, %v454_v40, %v467_v42  ;;  %v630_v40 = vld [vmem:[#allocation7 + $0x28] sm:$0xff] }
 0x159   :  { %1397 = vmatmul.mubr.f32.vlgmr.msra.gmra.mxu0 %v469_v43  ;;  %v662_v42 = vld [vmem:[#allocation7 + $0x128] sm:$0xff]  ;;  %1246 = vmatpush3.msra.mxu1 %v630_v40  ;;  %v645_v43 = vld [vmem:[#allocation7 + $0xa0] sm:$0xff] }
 0x15a   :  { %1400 = vmatpush3.msra.mxu0 %v672_v47  ;;  %1247 = vmatprep.subr.mxu1 %v645_v43  ;;  %v644_v47 = vld [vmem:[#allocation7 + $0x98] sm:$0xff] }
 0x15b   :  { %1401 = vmatprep.subr.mxu0 %v671_v50  ;;  %1248 = vmatpush3.msra.mxu1 %v629_v44 }
 0x15c   :  { %1402 = vmatpush3.msra.mxu0 %v671_v50  ;;  %1249 = vmatprep.subr.mxu1 %v644_v47  ;;  %v643_v50 = vld [vmem:[#allocation7 + $0x90] sm:$0xff] }
 0x15d   :  { %1403 = vmatprep.subr.mxu0 %v670_v56  ;;  %1250 = vmatpush3.msra.mxu1 %v628_v48 }
 0x15e   :  { %1404 = vmatpush3.msra.mxu0 %v670_v56  ;;  %v642_v56 = vld [vmem:[#allocation7 + $0x88] sm:$0xff]  ;;  %1251 = vmatprep.subr.mxu1 %v643_v50 }
 0x15f   :  { %1405 = vmatprep.subr.mxu0 %v669_v59  ;;  %1252 = vmatpush3.msra.mxu1 %v627_v51 }
 0x160   :  { %1406 = vmatpush3.msra.mxu0 %v669_v59  ;;  %1253 = vmatprep.subr.mxu1 %v642_v56  ;;  %v641_v59 = vld [vmem:[#allocation7 + $0x80] sm:$0xff] }
 0x161   :  { %1407 = vmatprep.subr.mxu0 %v668_v0  ;;  %1254 = vmatpush3.msra.mxu1 %v626_v57 }
 0x162   :  { %1408 = vmatpush3.msra.mxu0 %v668_v0  ;;  %1255 = vmatprep.subr.mxu1 %v641_v59 }
 0x163   :  { %1409 = vmatprep.subr.mxu0 %v667_v3  ;;  %1256 = vmatpush3.msra.mxu1 %v625_v60 }
 0x164   :  { %1410 = vmatpush3.msra.mxu0 %v667_v3  ;;  %1437 = vmatprep.subr.mxu1 %v1660_v19 }
 0x165   :  { %1411 = vmatprep.subr.mxu0 %v666_v6 }
 0x166   :  { %1412 = vmatpush3.msra.mxu0 %v666_v6 }
 0x167   :  { %1413 = vmatprep.subr.mxu0 %v665_v9 }
 0x168   :  { %1414 = vmatpush3.msra.mxu0 %v665_v9  ;;  %v552_v9 = vunpack.c.0.s8 %v551_v8 }
 0x169   :  { %1415 = vmatprep.subr.mxu0 %v664_v14 }
 0x16a   :  { %1416 = vmatpush3.msra.mxu0 %v664_v14  ;;  %v1901_v10 = vsub.s32 %v552_v9, %v1747_v27  ;;  %v998_v27 = vld [vmem:[#allocation8 + $0x70] sm:$0xff] }
 0x16b   :  { %1417 = vmatprep.subr.mxu0 %v663_v38 }
 0x16c   :  { %1418 = vmatpush3.msra.mxu0 %v663_v38 }
 0x16d   :  { %1419 = vmatprep.subr.mxu0 %v662_v42 }
 0x16e   :  { %1420 = vmatpush3.msra.mxu0 %v662_v42  ;;  %v122_v42 = vld [vmem:[%s2004_s6] sm:$0x1] }
 0x16f   :  { %1421 = vmatprep.subr.mxu0 %v661_v46 }
 0x170   :  { %1422 = vmatpush3.msra.mxu0 %v661_v46 }
 0x171   :  { %1423 = vmatprep.subr.mxu0 %v660_v49 }
 0x172   :  { %1424 = vmatpush3.msra.mxu0 %v660_v49 }
 0x173   :  { %1425 = vmatprep.subr.mxu0 %v659_v55 }
 0x174   :  { %1426 = vmatpush3.msra.mxu0 %v659_v55 }
 0x175   :  { %1427 = vmatprep.subr.mxu0 %v658_v58 }
 0x176   :  { %1428 = vmatpush3.msra.mxu0 %v658_v58 }
 0x177   :  { %1429 = vmatprep.subr.mxu0 %v657_v61 }
 0x178   :  { %1430 = vmatpush3.msra.mxu0 %v657_v61 }
 0x219   :  { %v536_v0 = vpop.f32.mrf.mxu0 }
 0x21a   :  { %v541_v1 = vmul.f32 0.001953125, %v536_v0 }
 0x21b   :  { %v1398_v2 = vpop.f32.mrf.mxu0 }
 0x21c   :  { %v542_v3 = vmul.f32 %v541_v1, %v541_v1 }
 0x21e   :  { %v544_v4 = vrot.slane %v542_v3, 7 }
 0x220   :  { %v546_v5 = vsub.f32 %v541_v1, %v544_v4 }
 0x222   :  { %v547_v6 = vadd.f32 1e-05, %v546_v5 }
 0x224   :  { %1521 = vrsqrt.f32 %v547_v6 }
 0x231   :  { %v1522_v11 = vpop.eup %1521 }
 0x232   :  { %v556_v14 = vrot.slane %v1522_v11, %v1901_v10 }
 0x234   :  { %v557_v15 = vcombine.high %v556_v14, %v556_v14 }
 0x236   :  { %v564_v38 = vrot.slane %v557_v15, %v1901_v10 }
 0x238   :  { %v566_v40 = vmul.f32 %v564_v38, %v121_v16 }
 0x23a   :  { %v571_v43 = vrot.slane %v566_v40, %v1909_v39  ;;  %v577_v44 = vmul.f32 %v566_v40, %v541_v1 }
 0x23c   :  { %v578_v46 = vsub.f32 %v122_v42, %v577_v44  ;;  %v575_v47 = vmul.f32 %v571_v43, %v1890_v63  ;;  %v576_v48 = vmul.f32 %v571_v43, %v1888_v62  ;;  %v573_v50 = vmul.f32 %v571_v43, %v1880_v53 }
 0x23d   :  { %v574_v51 = vmul.f32 %v571_v43, %v1878_v52 }
 0x23e   :  { %v583_v49 = vrot.slane %v578_v46, %v1909_v39 }
 0x240   :  { %v588_v55 = vadd.f32 %v583_v49, %v576_v48  ;;  %v585_v56 = vadd.f32 %v583_v49, %v573_v50  ;;  %v586_v57 = vadd.f32 %v583_v49, %v574_v51  ;;  %v587_v58 = vadd.f32 %v583_v49, %v575_v47 }
 0x242   :  { %vm589_vm8 = vcmp.gt.f32.partialorder %v585_v56, 0.0  ;;  %v593_v59 = vmul.f32 0.1, %v585_v56  ;;  %vm592_vm9 = vcmp.gt.f32.partialorder %v588_v55, 0.0  ;;  %v596_v60 = vmul.f32 0.1, %v588_v55 }
 0x243   :  { %vm590_vm10 = vcmp.gt.f32.partialorder %v586_v57, 0.0  ;;  %v594_v61 = vmul.f32 0.1, %v586_v57  ;;  %vm591_vm11 = vcmp.gt.f32.partialorder %v587_v58, 0.0  ;;  %v595_v63 = vmul.f32 0.1, %v587_v58 }
 0x244   :  { %v597_v0 = vsel %vm589_vm8, %v585_v56, %v593_v59  ;;  %v600_v62 = vsel %vm592_vm9, %v588_v55, %v596_v60 }
 0x245   :  { %v601_v1 = vrot.slane %v597_v0, 7  ;;  %v613_v2 = vrot.slane %v597_v0, 1  ;;  %737 = vmatprep.mubr.f32.mxu1 %v597_v0  ;;  %v604_v53 = vrot.slane %v600_v62, 7  ;;  %v598_v3 = vsel %vm590_vm10, %v586_v57, %v594_v61 }
 0x246   :  { %v614_v52 = vrot.slane %v598_v3, 1  ;;  %v599_v4 = vsel %vm591_vm11, %v587_v58, %v595_v63  ;;  %v616_v5 = vrot.slane %v600_v62, 1  ;;  %v602_v8 = vrot.slane %v598_v3, 7 }
 0x247   :  { %v608_v6 = vsel %vm186_vm0, %v604_v53, %v601_v1  ;;  %v615_v7 = vrot.slane %v599_v4, 1  ;;  %v603_v15 = vrot.slane %v599_v4, 7 }
 0x248   :  { %1133 = vmatmul.mubr.msk.f32.vlgmr.msra.gmra.mxu1 %vm1759_vm1, %v608_v6  ;;  %v619_v9 = vsel %vm211_vm3, %v613_v2, %v614_v52  ;;  %v607_v41 = vsel %vm186_vm0, %v601_v1, %v602_v8  ;;  %v620_v16 = vsel %vm211_vm3, %v616_v5, %v613_v2 }
 0x249   :  { %1431 = vmatprep.mubr.f32.mxu0 %v619_v9  ;;  %742 = vmatprep.mubr.f32.mxu1 %v598_v3  ;;  %v618_v11 = vsel %vm211_vm3, %v614_v52, %v615_v7  ;;  %v617_v14 = vsel %vm211_vm3, %v615_v7, %v616_v5  ;;  %v606_v12 = vsel %vm186_vm0, %v602_v8, %v603_v15 }
 0x24a   :  { %1432 = vmatmul.mubr.msk.f32.vlgmr.msra.gmra.mxu0 %vm1796_vm4, %v618_v11  ;;  %1438 = vmatpush3.msra.mxu1 %v1812_v18  ;;  %v605_v17 = vsel %vm186_vm0, %v603_v15, %v604_v53  ;;  %v996_v18 = vld [vmem:[#allocation8 + $0x60] sm:$0xff] }
 0x24b   :  { %1434 = vmatprep.mubr.f32.mxu0 %v617_v14  ;;  %1439 = vmatprep.subr.mxu1 %v1660_v19 }
 0x24c   :  { %743 = vmatmul.mubr.f32.gmra.mxu1 %v607_v41 }
 0x24d   :  { %747 = vmatprep.mubr.f32.mxu1 %v599_v4  ;;  %1440 = vmatpush3.msra.mxu1 %v1815_v20  ;;  %v995_v20 = vld [vmem:[#allocation8 + $0x58] sm:$0xff] }
 0x24e   :  { %1435 = vmatmul.mubr.msk.f32.gmra.mxu0 %vm1806_vm5, %v620_v16  ;;  %1441 = vmatprep.subr.mxu1 %v1660_v19 }
 0x24f   :  { %1442 = vmatpush3.msra.mxu1 %v1821_v21  ;;  %1504 = vmatprep.mubr.f32.mxu0 %v1744_v13  ;;  %v999_v13 = vld [vmem:[#allocation8 + $0x78] sm:$0xff]  ;;  %v994_v21 = vld [vmem:[#allocation8 + $0x50] sm:$0xff] }
 0x250   :  { %1135 = vmatmul.mubr.msk.f32.gmra.mxu1 %vm1776_vm2, %v606_v12  ;;  %1443 = vmatprep.subr.mxu1 %v1660_v19 }
 0x251   :  { %752 = vmatprep.mubr.f32.mxu1 %v600_v62  ;;  %1444 = vmatpush3.msra.mxu1 %v1825_v22  ;;  %v993_v22 = vld [vmem:[#allocation8 + $0x48] sm:$0xff] }
 0x252   :  { %1445 = vmatprep.subr.mxu1 %v1660_v19  ;;  %1472 = vmatprep.subr.mxu0 %v999_v13 }
 0x253   :  { %1446 = vmatpush3.msra.mxu1 %v1829_v23  ;;  %1473 = vmatpush3.msra.mxu0 %v999_v13  ;;  %v991_v23 = vld [vmem:[#allocation8 + $0x38] sm:$0xff] }
 0x254   :  { %753 = vmatmul.mubr.f32.gmra.mxu1 %v605_v17  ;;  %1447 = vmatprep.subr.mxu1 %v1660_v19 }
 0x255   :  { %1448 = vmatpush3.msra.mxu1 %v1833_v24  ;;  %1469 = vmatprep.mubr.msk.f32.mxu1 %vm1661_vm6, %v1660_v19  ;;  %v990_v24 = vld [vmem:[#allocation8 + $0x30] sm:$0xff] }
 0x256   :  { %1449 = vmatprep.subr.mxu1 %v1660_v19  ;;  %1474 = vmatprep.subr.mxu0 %v998_v27 }
 0x257   :  { %1450 = vmatpush3.msra.mxu1 %v1837_v25  ;;  %1475 = vmatpush3.msra.mxu0 %v998_v27  ;;  %v989_v25 = vld [vmem:[#allocation8 + $0x28] sm:$0xff] }
 0x258   :  { %1451 = vmatprep.subr.mxu1 %v1660_v19  ;;  %1476 = vmatprep.subr.mxu0 %v997_v54 }
 0x259   :  { %1452 = vmatpush3.msra.mxu1 %v1841_v26  ;;  %1477 = vmatpush3.msra.mxu0 %v997_v54  ;;  %v988_v26 = vld [vmem:[#allocation8 + $0x20] sm:$0xff] }
 0x25a   :  { %1453 = vmatprep.subr.mxu1 %v1660_v19  ;;  %1478 = vmatprep.subr.mxu0 %v996_v18 }
 0x25b   :  { %1454 = vmatpush3.msra.mxu1 %v1845_v28  ;;  %1479 = vmatpush3.msra.mxu0 %v996_v18  ;;  %v987_v28 = vld [vmem:[#allocation8 + $0x18] sm:$0xff] }
 0x25c   :  { %1455 = vmatprep.subr.mxu1 %v1660_v19  ;;  %1480 = vmatprep.subr.mxu0 %v995_v20 }
 0x25d   :  { %1456 = vmatpush3.msra.mxu1 %v1849_v30  ;;  %1481 = vmatpush3.msra.mxu0 %v995_v20  ;;  %v986_v30 = vld [vmem:[#allocation8 + $0x10] sm:$0xff] }
 0x25e   :  { %1457 = vmatprep.subr.mxu1 %v1660_v19  ;;  %1482 = vmatprep.subr.mxu0 %v994_v21 }
 0x25f   :  { %1458 = vmatpush3.msra.mxu1 %v1852_v31  ;;  %1483 = vmatpush3.msra.mxu0 %v994_v21  ;;  %v985_v31 = vld [vmem:[#allocation8 + $0x8] sm:$0xff] }
 0x260   :  { %1459 = vmatprep.subr.mxu1 %v1660_v19  ;;  %1484 = vmatprep.subr.mxu0 %v993_v22 }
 0x261   :  { %1460 = vmatpush3.msra.mxu1 %v1855_v32  ;;  %1485 = vmatpush3.msra.mxu0 %v993_v22  ;;  %v984_v32 = vld [vmem:[#allocation8] sm:$0xff] }
 0x262   :  { %1461 = vmatprep.subr.mxu1 %v1660_v19 }
 0x263   :  { %1462 = vmatpush3.msra.mxu1 %v1861_v33 }
 0x264   :  { %1463 = vmatprep.subr.mxu1 %v1660_v19 }
 0x265   :  { %1464 = vmatpush3.msra.mxu1 %v1865_v34 }
 0x266   :  { %1465 = vmatprep.subr.mxu1 %v1660_v19 }
 0x267   :  { %1466 = vmatpush3.msra.mxu1 %v1869_v35 }
 0x268   :  { %1467 = vmatprep.subr.mxu1 %v1660_v19  ;;  %v992_v19 = vld [vmem:[#allocation8 + $0x40] sm:$0xff] }
 0x269   :  { %1468 = vmatpush3.msra.mxu1 %v1873_v36  ;;  %1486 = vmatprep.subr.mxu0 %v992_v19 }
 0x26a   :  { %1487 = vmatpush3.msra.mxu0 %v992_v19  ;;  %v123_v19 = vld [vmem:[%s2005_s7] sm:$0x1]  ;;  %s1663_s7 = smov [#allocation11]  }
 0x26b   :  { %1488 = vmatprep.subr.mxu0 %v991_v23 }
 0x26c   :  { %1489 = vmatpush3.msra.mxu0 %v991_v23 }
 0x26d   :  { %1490 = vmatprep.subr.mxu0 %v990_v24 }
 0x26e   :  { %1491 = vmatpush3.msra.mxu0 %v990_v24 }
 0x26f   :  { %1492 = vmatprep.subr.mxu0 %v989_v25 }
 0x270   :  { %1493 = vmatpush3.msra.mxu0 %v989_v25 }
 0x271   :  { %1494 = vmatprep.subr.mxu0 %v988_v26 }
 0x272   :  { %1495 = vmatpush3.msra.mxu0 %v988_v26  ;;  %v124_v26 = vld [vmem:[%s2006_s8] sm:$0x1]  ;;  %s1110_s8 = sshll.u32 %s1663_s7, 4  ;;  %s1111_s8 = int_to_ptr.vmem [resolvable:$true] %s1110_s8 }
 0x273   :  { %1496 = vmatprep.subr.mxu0 %v987_v28  ;;  %s1625_s18 = scalar_lea.vmem %s1111_s8, 512  ;;  %p1630_p12 = scmp.lt.s32.totalorder %s1111_s8, %s1111_s8 }
 0x274   :  { %1497 = vmatpush3.msra.mxu0 %v987_v28  ;;  %p1626_p11 = scmp.ne.s32.totalorder %s1111_s8, %s1625_s18  ;;  %p1631_p13 = scmp.lt.s32.totalorder %s1625_s18, %s1625_s18 }
 0x275   :  { %1498 = vmatprep.subr.mxu0 %v986_v30 }
 0x276   :  { %1499 = vmatpush3.msra.mxu0 %v986_v30  ;;  %p1632_p0 = por %p1631_p13, %p1630_p12 }
 0x277   :  { %1500 = vmatprep.subr.mxu0 %v985_v31 }
 0x278   :  { %1501 = vmatpush3.msra.mxu0 %v985_v31  ;;  %p1633_p1 = pnand %p1632_p0, %p1626_p11 }
 0x279   :  { %1502 = vmatprep.subr.mxu0 %v984_v32 }
 0x27a   :  { %1503 = vmatpush3.msra.mxu0 %v984_v32 }
 0x27b   :  { %1505 = vmatmul.mubr.f32.vlgmr.msra.gmra.mxu0 %v1755_v37 }
 0x27c   :  { %1507 = vmatprep.mubr.f32.mxu0 %v1765_v45 }
 0x27f   :  { %1508 = vmatmul.mubr.f32.gmra.mxu0 %v1749_v29 }
 0x308   :  { %v1257_v33 = vpop.f32.mrf.mxu1 }
 0x30a   :  { %v1433_v34 = vpop.f32.mrf.mxu0  ;;  %v1258_v35 = vpop.f32.mrf.mxu1 }
 0x30b   :  { %v1259_v42 = vadd.f32 %v1258_v35, %v1257_v33 }
 0x30c   :  { %v824_v36 = vpop.f32.mrf.mxu0  ;;  %v1260_v38 = vpop.f32.mrf.mxu1 }
 0x30d   :  { %v825_v49 = vadd.f32 %v1259_v42, %v824_v36 }
 0x30e   :  { %v1261_v40 = vpop.f32.mrf.mxu1  ;;  %v1436_v44 = vpop.f32.mrf.mxu0 }
 0x30f   :  { %v1262_v43 = vadd.f32 %v1261_v40, %v1260_v38  ;;  %v852_v29 = vmul.f32 %v825_v49, %v825_v49 }
 0x310   :  { %v1263_v46 = vpop.f32.mrf.mxu1  ;;  %v834_v51 = vpop.f32.mrf.mxu0 }
 0x311   :  { %v830_v47 = vadd.f32 %v1433_v34, %v1262_v43 }
 0x312   :  { %v1264_v48 = vpop.f32.mrf.mxu1 }
 0x313   :  { %v1265_v50 = vadd.f32 %v1264_v48, %v1263_v46  ;;  %v853_v55 = vmul.f32 %v830_v47, %v830_v47  ;;  %v843_v57 = vadd.f32 %v830_v47, %v825_v49 }
 0x314   :  { %v1266_v37 = vpop.f32.mrf.mxu1 }
 0x315   :  { %v835_v45 = vadd.f32 %v1265_v50, %v834_v51  ;;  %v856_v60 = vadd.f32 %v853_v55, %v852_v29 }
 0x316   :  { %v1267_v56 = vpop.f32.mrf.mxu1 }
 0x317   :  { %v854_v58 = vmul.f32 %v835_v45, %v835_v45  ;;  %v1268_v59 = vadd.f32 %v1267_v56, %v1266_v37  ;;  %v844_v61 = vadd.f32 %v843_v57, %v835_v45 }
 0x319   :  { %v840_v63 = vadd.f32 %v1436_v44, %v1268_v59  ;;  %v857_v0 = vadd.f32 %v856_v60, %v854_v58 }
 0x31b   :  { %v845_v62 = vadd.f32 %v844_v61, %v840_v63  ;;  %v855_v1 = vmul.f32 %v840_v63, %v840_v63 }
 0x31d   :  { %v846_v2 = vrot.slane %v845_v62, 4  ;;  %v858_v53 = vadd.f32 %v857_v0, %v855_v1 }
 0x31f   :  { %v847_v3 = vadd.f32 %v846_v2, %v845_v62  ;;  %v859_v52 = vrot.slane %v858_v53, 4 }
 0x321   :  { %v848_v4 = vrot.slane %v847_v3, 2  ;;  %v860_v5 = vadd.f32 %v859_v52, %v858_v53 }
 0x323   :  { %v849_v6 = vadd.f32 %v848_v4, %v847_v3  ;;  %v861_v7 = vrot.slane %v860_v5, 2 }
 0x325   :  { %v850_v8 = vrot.slane %v849_v6, 1  ;;  %v862_v9 = vadd.f32 %v861_v7, %v860_v5 }
 0x327   :  { %v863_v11 = vrot.slane %v862_v9, 1  ;;  %v851_v14 = vadd.f32 %v850_v8, %v849_v6 }
 0x329   :  { %v864_v41 = vadd.f32 %v863_v11, %v862_v9 }
 0x32b   :  { %v865_v15 = vsel %vm468_vm7, %v851_v14, %v864_v41 }
 0x32c   :  { %1470 = vmatmul.mubr.f32.vlgmr.msra.gmra.mxu1 %v865_v15 }
 0x33b   :  { %v1506_v23 = vpop.f32.mrf.mxu0 }
 0x33d   :  { %v1066_v28 = vpop.f32.mrf.mxu0 }
 0x33f   :  { %v1509_v34 = vpop.f32.mrf.mxu0 }
 0x341   :  { %v1076_v46 = vpop.f32.mrf.mxu0 }
 0x3ec   :  { %v932_v16 = vpop.f32.mrf.mxu1 }
 0x3ed   :  { %v936_v12 = vmul.f32 0.001953125, %v932_v16 }
 0x3ee   :  { %v1471_v17 = vpop.f32.mrf.mxu1 }
 0x3ef   :  { %v937_v13 = vmul.f32 %v936_v12, %v936_v12 }
 0x3f1   :  { %v939_v27 = vrot.slane %v937_v13, 7 }
 0x3f3   :  { %v941_v54 = vsub.f32 %v936_v12, %v939_v27 }
 0x3f5   :  { %v942_v18 = vadd.f32 1e-05, %v941_v54 }
 0x3f7   :  { %1523 = vrsqrt.f32 %v942_v18 }
 0x404   :  { %v1524_v20 = vpop.eup %1523 }
 0x405   :  { %v951_v21 = vrot.slane %v1524_v20, %v1901_v10 }
 0x407   :  { %v952_v22 = vcombine.high %v951_v21, %v951_v21 }
 0x409   :  { %v959_v24 = vrot.slane %v952_v22, %v1901_v10 }
 0x40b   :  { %v961_v25 = vmul.f32 %v959_v24, %v123_v19 }
 0x40d   :  { %v966_v30 = vrot.slane %v961_v25, %v1909_v39  ;;  %v972_v31 = vmul.f32 %v961_v25, %v936_v12 }
 0x40f   :  { %v973_v32 = vsub.f32 %v124_v26, %v972_v31  ;;  %v969_v33 = vmul.f32 %v966_v30, %v830_v47  ;;  %v968_v36 = vmul.f32 %v966_v30, %v825_v49  ;;  %v971_v38 = vmul.f32 %v966_v30, %v840_v63 }
 0x410   :  { %v970_v40 = vmul.f32 %v966_v30, %v835_v45 }
 0x411   :  { %v978_v35 = vrot.slane %v973_v32, %v1909_v39 }
 0x413   :  { %v981_v42 = vadd.f32 %v978_v35, %v969_v33  ;;  %v980_v43 = vadd.f32 %v978_v35, %v968_v36  ;;  %v983_v10 = vadd.f32 %v978_v35, %v971_v38  ;;  %v982_v44 = vadd.f32 %v978_v35, %v970_v40 }
 0x415   :  { %v1086_v48 = vadd.f32 %v1506_v23, %v981_v42  ;;  %v1085_v50 = vadd.f32 %v1066_v28, %v980_v43  ;;  %v1088_v51 = vadd.f32 %v1509_v34, %v983_v10  ;;  %v1087_v37 = vadd.f32 %v1076_v46, %v982_v44 }
 0x417   :  { %vm1090_vm12 = vcmp.gt.f32.partialorder %v1086_v48, 0.0  ;;  %v1094_v55 = vmul.f32 0.1, %v1086_v48  ;;  %vm1089_vm13 = vcmp.gt.f32.partialorder %v1085_v50, 0.0  ;;  %v1093_v47 = vmul.f32 0.1, %v1085_v50 }
 0x418   :  { %vm1092_vm14 = vcmp.gt.f32.partialorder %v1088_v51, 0.0  ;;  %v1096_v39 = vmul.f32 0.1, %v1088_v51  ;;  %vm1091_vm15 = vcmp.gt.f32.partialorder %v1087_v37, 0.0  ;;  %v1095_v49 = vmul.f32 0.1, %v1087_v37 }
 0x419   :  { %v1098_v45 = vsel %vm1090_vm12, %v1086_v48, %v1094_v55  ;;  %v1097_v56 = vsel %vm1089_vm13, %v1085_v50, %v1093_v47 }
 0x41a   :  { %1102 = vst [vmem:[#allocation11 + $0x8] sm:$0xff] %v1098_v45  ;;  %1101 = vst [vmem:[#allocation11] sm:$0xff] %v1097_v56  ;;  %v1100_v29 = vsel %vm1092_vm14, %v1088_v51, %v1096_v39  ;;  %v1099_v57 = vsel %vm1091_vm15, %v1087_v37, %v1095_v49 }
 0x41b   :  { %1104 = vst [vmem:[#allocation11 + $0x18] sm:$0xff] %v1100_v29  ;;  %1103 = vst [vmem:[#allocation11 + $0x10] sm:$0xff] %v1099_v57 }
 0x41c   :  { %1636 = shalt.err (!%p1633_p1)
}
 0x41d   :  { %1116 = dma.vmem_to_hbm [thread:$0]  %s1111_s8, 512, %s2007_s9, [#allocation4], %s1655_s14, %s1655_s14, %s1656_s15  }
 0x41e   :  { %1651 = dma.done.wait [#allocation4], 512  }
 0x41f   :  { %1652 = vsyncadd [#allocation4], 4294966784 }
 0x420   :  { %1120 = vsyncpa [#allocation3], 1 }
 0x421   :  { %1121 = vsyncpa [#allocation6], 1 }
 0x422   :  { %1122 = vsyncpa [#allocation9], 1 }
 0x423   :  { %1123 = vsyncpa [#allocation4], 1 }

</bundles_post_ra>
